<compile_context>
chip_gen: v7x
topology: tpu7x:2x2x1
jax: 0.10.0
libtpu: 0.0.40
codegen_flags: <defaults>
</compile_context>

<pallas_src>
import functools

import jax
import jax.numpy as jnp
from jax import lax
from jax.experimental import pallas as pl
from jax.experimental.pallas import tpu as pltpu


def _attention_kernel(*refs, mask_value, has_bias):
    """Grid = (batch, q_tile, head_group).  The group axis is the out-proj reduction.

    q_ref   : (g, tq, d)   query heads of this (batch, q-tile, group)
    k_ref   : (g, S, d)    key heads of this (batch, group)
    v_ref   : (g, S, d)    value heads of this (batch, group)
    bias_ref: (hb, qb, S)  raw position bias block (hb in {1, g}, qb in {1, tq}); optional
    wo_ref  : (g, d, H)    per-group slice of the output projection
    out_ref : (tq, H)
    acc_ref : (tq, H) f32  output-projection accumulator over head groups
    """
    if has_bias:
        q_ref, k_ref, v_ref, bias_ref, wo_ref, out_ref, acc_ref = refs
    else:
        q_ref, k_ref, v_ref, wo_ref, out_ref, acc_ref = refs
        bias_ref = None

    gi = pl.program_id(2)
    ng = pl.num_programs(2)

    @pl.when(gi == 0)
    def _init_acc():
        acc_ref[...] = jnp.zeros_like(acc_ref)

    q = q_ref[...]                                                          # (g, tq, d)
    k = k_ref[...]                                                          # (g, S, d)
    v = v_ref[...]                                                          # (g, S, d)

    # Per-head scores inside the group (batched over g).  Pix2Struct uses NO 1/sqrt(d).
    s = jnp.einsum('gqd,gkd->gqk', q, k,
                   preferred_element_type=jnp.float32)                      # (g, tq, S)

    if has_bias:
        # masked_fill(position_bias == 1, finfo.min) done on the VMEM block, then the
        # additive bias and the torch.max(scores, finfo.min) clamp.
        pb = bias_ref[...].astype(jnp.float32)
        pb = jnp.where(pb == 1.0, mask_value, pb)
        s = s + pb
        s = jnp.maximum(s, mask_value)

    # Softmax in f32; the normalization is folded into the small (g, tq, d) context.
    m = jnp.max(s, axis=-1, keepdims=True)
    e = jnp.exp(s - m)                                                      # (g, tq, S)
    denom = jnp.sum(e, axis=-1, keepdims=True)                              # (g, tq, 1)
    ctx = jnp.einsum('gqk,gkd->gqd', e.astype(v.dtype), v,
                     preferred_element_type=jnp.float32)                    # (g, tq, d)
    ctx = ctx * pl.reciprocal(denom, approx=False)

    # Per-group slice of the output projection; a single accumulator update per step.
    part = jnp.einsum('gqd,gdh->gqh', ctx.astype(wo_ref.dtype), wo_ref[...],
                      preferred_element_type=jnp.float32)                   # (g, tq, H)
    acc_ref[...] += jnp.sum(part, axis=0)                                   # (tq, H)

    @pl.when(gi == ng - 1)
    def _finalize():
        out_ref[...] = acc_ref[...].astype(out_ref.dtype)


def _vmem_capacity_bytes():
    try:
        return int(pltpu.get_tpu_info().vmem_capacity_bytes)
    except Exception:
        return 64 * 1024 * 1024  # conservative fallback (v7x per-TC VMEM)


def _bias_spec(pb, batch, n_heads, g, tq, seq_len):
    """BlockSpec for a 4-D (Bb, Hb, Qb, S) bias, broadcasting size-1 axes in-kernel."""
    Bb, Hb, Qb, Sb = pb.shape
    assert Sb == seq_len and Bb in (1, batch) and Hb in (1, n_heads) and Qb in (1, seq_len)
    hb = g if Hb != 1 else 1
    qb = tq if Qb != 1 else 1
    b_full, h_full, q_full = Bb != 1, Hb != 1, Qb != 1

    def idx(b, qi, gi):
        return (b if b_full else 0, gi if h_full else 0, qi if q_full else 0, 0)

    return pl.BlockSpec((None, hb, qb, seq_len), idx)


def pix2struct_vision_attention(hidden_states, wq, wk, wv, wo, *, n_heads,
                                attention_mask=None, position_bias=None,
                                compute_dtype=jnp.bfloat16, q_tile=None,
                                head_group=None):
    """hidden_states: (B, S, H); w*: (out_features, in_features) torch nn.Linear layout.

    Returns (attn_output, position_bias) like the torch module in eval mode.  When the
    bias is derived from a (possibly absent) 2-D attention_mask, the returned
    position_bias is the compact broadcast-equivalent (B, 1, 1, S) form.
    """
    B, S, H = hidden_states.shape
    assert H % n_heads == 0, "hidden_size must be divisible by num_attention_heads"
    d = H // n_heads
    out_dtype = hidden_states.dtype
    osz = jnp.dtype(out_dtype).itemsize
    mask_value = float(jnp.finfo(out_dtype).min)

    cdt = jnp.dtype(compute_dtype) if compute_dtype is not None else jnp.dtype(out_dtype)
    isz = cdt.itemsize

    # ---- head grouping: g heads per grid step, g*d <= 256 (full MXU depth/width) ----
    if head_group is None:
        g = 1
        for cand in (8, 4, 2):
            if n_heads % cand == 0 and cand * d <= 256:
                g = cand
                break
    else:
        g = int(head_group)
        assert n_heads % g == 0
    ng = n_heads // g

    # ---- position-bias handling (mirrors the torch module) -------------------------
    has_bias = True
    bias_arr = None
    if position_bias is None:
        if attention_mask is None:
            # torch: ones mask -> position_bias == 0 everywhere -> bias add & clamp are
            # no-ops; specialize them away.  Returned bias is broadcast-equivalent to
            # the torch (B, n_heads, S, S) zeros tensor.
            has_bias = False
            position_bias = jnp.zeros((B, 1, 1, S), dtype=out_dtype)
        elif attention_mask.ndim == 2:
            # Compact per-key bias; masked_fill happens inside the kernel.
            position_bias = (1.0 - attention_mask.astype(out_dtype)).reshape(B, 1, 1, S)
            bias_arr = position_bias
        else:
            position_bias = 1.0 - (jnp.zeros((1, n_heads, S, S), dtype=out_dtype)
                                   + attention_mask.astype(out_dtype))
            bias_arr = position_bias
    else:
        pb = position_bias
        while pb.ndim < 4:
            pb = pb[None]
        bias_arr = pb

    # ---- hoisted projections (full-shape XLA GEMMs), head-group-major layout --------
    hp = lax.Precision.HIGHEST
    x = hidden_states.astype(cdt)

    def to_heads(w):
        y = jnp.einsum('bsh,oh->bso', x, w.astype(cdt), precision=hp)      # (B, S, H)
        return y.reshape(B, S, ng, g, d).transpose(0, 2, 3, 1, 4)          # (B, ng, g, S, d)

    q_h, k_h, v_h = to_heads(wq), to_heads(wk), to_heads(wv)
    wo_g = wo.astype(cdt).T.reshape(ng, g, d, H)                            # (ng, g, d, H)

    # ---- q-tile / VMEM budget from the actual chip ----------------------------------
    cap = _vmem_capacity_bytes()
    bisz = bias_arr.dtype.itemsize if has_bias else 0

    def est_bytes(tq):
        pad = lambda n: -(-n // 128) * 128   # lane padding
        padr = lambda n: -(-n // 8) * 8      # sublane padding
        e = 0
        e += 2 * g * padr(tq) * pad(d) * isz          # Q blocks (double-buffered)
        e += 2 * 2 * g * padr(S) * pad(d) * isz       # K + V blocks
        e += 2 * g * padr(d) * pad(H) * isz           # Wo group block
        e += 2 * padr(tq) * pad(H) * osz              # output block
        e += padr(tq) * pad(H) * 4                    # f32 accumulator scratch
        if has_bias:
            hb = g if bias_arr.shape[1] != 1 else 1
            qb = tq if bias_arr.shape[2] != 1 else 1
            e += 2 * hb * padr(qb) * pad(S) * bisz    # bias blocks
        e += 4 * g * padr(tq) * pad(S) * 4            # live f32 score / exp tiles
        e += 2 * g * padr(tq) * pad(H) * 4            # per-group out-proj partial
        return e

    if q_tile is not None:
        assert S % q_tile == 0, "q_tile must divide seq_len"
        tq = q_tile
    else:
        cands = [t for t in (512, 256, 128, 64, 32, 16, 8) if S % t == 0]
        tq = None
        for t in cands:
            if est_bytes(t) <= int(0.8 * cap):
                tq = t
                break
        if tq is None:
            tq = cands[-1] if cands else S
    n_q = S // tq

    vmem_limit = int(min(max(2 * est_bytes(tq), 32 * 1024 * 1024), int(0.9 * cap)))

    # ---- pallas_call -----------------------------------------------------------------
    in_specs = [
        pl.BlockSpec((None, None, g, tq, d), lambda b, qi, gi: (b, gi, 0, qi, 0)),  # Q
        pl.BlockSpec((None, None, g, S, d), lambda b, qi, gi: (b, gi, 0, 0, 0)),    # K
        pl.BlockSpec((None, None, g, S, d), lambda b, qi, gi: (b, gi, 0, 0, 0)),    # V
    ]
    args = [q_h, k_h, v_h]
    if has_bias:
        in_specs.append(_bias_spec(bias_arr, B, n_heads, g, tq, S))
        args.append(bias_arr)
    in_specs.append(pl.BlockSpec((None, g, d, H), lambda b, qi, gi: (gi, 0, 0, 0)))  # Wo
    args.append(wo_g)

    kernel = functools.partial(_attention_kernel, mask_value=mask_value,
                               has_bias=has_bias)

    attn_output = pl.pallas_call(
        kernel,
        out_shape=jax.ShapeDtypeStruct((B, S, H), out_dtype),
        grid=(B, n_q, ng),
        in_specs=in_specs,
        out_specs=pl.BlockSpec((None, tq, H), lambda b, qi, gi: (b, qi, 0)),
        scratch_shapes=[pltpu.VMEM((tq, H), jnp.float32)],
        compiler_params=pltpu.CompilerParams(
            # batch and q-tile are independent (K/V build is hoisted); the head-group
            # axis is the output-projection reduction (accumulator in scratch).
            dimension_semantics=("parallel", "parallel", "arbitrary"),
            vmem_limit_bytes=vmem_limit,
        ),
    )(*args)

    return attn_output, position_bias


def _reference(hidden_states, wq, wk, wv, wo, n_heads,
               attention_mask=None, position_bias=None):
    """Pure-JAX reference mirroring the torch forward (eval mode)."""
    B, S, H = hidden_states.shape
    d = H // n_heads
    dtype = hidden_states.dtype
    hp = lax.Precision.HIGHEST

    def proj(w):  # torch Linear: x @ w.T ; then (B, S, nh, d) -> (B, nh, S, d)
        y = jnp.einsum('bsh,oh->bso', hidden_states, w, precision=hp)
        return y.reshape(B, S, n_heads, d).transpose(0, 2, 1, 3)

    q, k, v = proj(wq), proj(wk), proj(wv)
    scores = jnp.einsum('bhqd,bhkd->bhqk', q, k, precision=hp)

    if position_bias is None:
        if attention_mask is None:
            attention_mask = jnp.ones((B, S), dtype=dtype)
        pb = jnp.zeros((1, n_heads, S, S), dtype=dtype)
        if attention_mask.ndim == 2:
            pb = pb + attention_mask[:, None, None, :]
        else:
            pb = pb + attention_mask
        position_bias = 1.0 - pb

    mask_value = jnp.finfo(dtype).min
    pbm = jnp.where(position_bias == 1.0, mask_value, position_bias)
    scores = scores + pbm
    scores = jnp.maximum(scores, mask_value)
    p = jax.nn.softmax(scores.astype(jnp.float32), axis=-1).astype(dtype)
    ctx = jnp.einsum('bhqk,bhkd->bhqd', p, v, precision=hp)
    ctx = ctx.transpose(0, 2, 1, 3).reshape(B, S, H)
    out = jnp.einsum('bsh,oh->bso', ctx, wo, precision=hp)
    return out, position_bias


if __name__ == "__main__":
    # Small config consistent with the module: hidden_size=32, num_heads=4, seq=8.
    B, S, H, NH = 2, 8, 32, 4

    key = jax.random.PRNGKey(0)
    k_x, k_q, k_k, k_v, k_o, k_m = jax.random.split(key, 6)

    hidden_states = jax.random.normal(k_x, (B, S, H), dtype=jnp.float32)
    wq = jax.random.normal(k_q, (H, H), dtype=jnp.float32) * 0.05
    wk = jax.random.normal(k_k, (H, H), dtype=jnp.float32) * 0.05
    wv = jax.random.normal(k_v, (H, H), dtype=jnp.float32) * 0.05
    wo = jax.random.normal(k_o, (H, H), dtype=jnp.float32) * 0.05

    ref1, ref_pb1 = _reference(hidden_states, wq, wk, wv, wo, NH)

    # 1) No mask, f32 compute (trace-time specialized: no bias add / clamp in-kernel).
    out1, pb1 = pix2struct_vision_attention(hidden_states, wq, wk, wv, wo, n_heads=NH,
                                            compute_dtype=jnp.float32)
    out1 = jax.block_until_ready(out1)
    assert out1.shape == (B, S, H)
    assert jnp.allclose(out1, ref1, rtol=1e-3, atol=1e-3), "no-mask output mismatch"
    assert jnp.allclose(jnp.broadcast_to(pb1, ref_pb1.shape), ref_pb1), \
        "position_bias mismatch"

    # 2) Explicit 2-D attention mask (compact per-key bias, masked_fill done in-kernel).
    mask = (jax.random.uniform(k_m, (B, S)) > 0.3).astype(jnp.float32)
    mask = mask.at[:, 0].set(1.0)  # keep at least one visible key per row
    ref2, ref_pb2 = _reference(hidden_states, wq, wk, wv, wo, NH, attention_mask=mask)
    out2, pb2 = pix2struct_vision_attention(hidden_states, wq, wk, wv, wo, n_heads=NH,
                                            attention_mask=mask,
                                            compute_dtype=jnp.float32)
    out2 = jax.block_until_ready(out2)
    assert jnp.allclose(out2, ref2, rtol=1e-3, atol=1e-3), "masked output mismatch"
    assert jnp.allclose(jnp.broadcast_to(pb2, ref_pb2.shape), ref_pb2), \
        "masked position_bias mismatch"

    # 3) Reuse the returned compact position_bias (as a second layer would).
    out3, _ = pix2struct_vision_attention(hidden_states, wq, wk, wv, wo, n_heads=NH,
                                          position_bias=pb2, compute_dtype=jnp.float32)
    out3 = jax.block_until_ready(out3)
    assert jnp.allclose(out3, ref2, rtol=1e-3, atol=1e-3), "compact bias path mismatch"

    # 4) Full (B, nh, S, S) position_bias (per-head / per-query streaming path).
    pb_full = jnp.broadcast_to(pb2, (B, NH, S, S))
    out4, _ = pix2struct_vision_attention(hidden_states, wq, wk, wv, wo, n_heads=NH,
                                          position_bias=pb_full,
                                          compute_dtype=jnp.float32)
    out4 = jax.block_until_ready(out4)
    assert jnp.allclose(out4, ref2, rtol=1e-3, atol=1e-3), "full bias path mismatch"

    # 5) Default bf16 MXU-native compute path (f32 accumulation / softmax kept).
    out5, _ = pix2struct_vision_attention(hidden_states, wq, wk, wv, wo, n_heads=NH)
    out5 = jax.block_until_ready(out5)
    assert jnp.allclose(out5, ref1, rtol=1e-1, atol=3e-2), "bf16 output mismatch"

    print("KERNEL_OK")
</pallas_src>

<mosaic_0001>
module attributes {stable_mosaic.version = 11 : i64} {
  func.func @_attention_kernel(%arg0: i32, %arg1: i32, %arg2: i32, %arg3: memref<1x1x4x8x8xf32, #tpu.memory_space<vmem>>, %arg4: memref<1x1x4x8x8xf32, #tpu.memory_space<vmem>>, %arg5: memref<1x1x4x8x8xf32, #tpu.memory_space<vmem>>, %arg6: memref<1x4x8x32xf32, #tpu.memory_space<vmem>>, %arg7: memref<1x8x32xf32, #tpu.memory_space<vmem>>, %arg8: memref<8x32xf32, #tpu.memory_space<vmem>>) attributes {dimension_semantics = [#tpu.dimension_semantics<parallel>, #tpu.dimension_semantics<parallel>, #tpu.dimension_semantics<arbitrary>], iteration_bounds = array<i64: 2, 1, 1>, scalar_prefetch = 0 : i64, scratch_operands = 1 : i64, tpu.core_type = #tpu.core_type<tc>, window_params = [{transform_indices = @transform_0, window_bounds = array<i64: 1, 1, 4, 8, 8>}, {transform_indices = @transform_1, window_bounds = array<i64: 1, 1, 4, 8, 8>}, {transform_indices = @transform_2, window_bounds = array<i64: 1, 1, 4, 8, 8>}, {transform_indices = @transform_3, window_bounds = array<i64: 1, 4, 8, 32>}, {transform_indices = @transform_4, window_bounds = array<i64: 1, 8, 32>}]} {
    %c0_i32 = arith.constant 0 : i32
    %0 = arith.cmpi eq, %arg2, %c0_i32 : i32
    %1 = arith.extui %0 : i1 to i32
    %c0_i32_0 = arith.constant 0 : i32
    %2 = arith.cmpi ne, %1, %c0_i32_0 : i32
    scf.if %2 {
      %cst_30 = arith.constant 0.000000e+00 : f32
      %31 = vector.broadcast %cst_30 : f32 to vector<8x32xf32>
      %c0_31 = arith.constant 0 : index
      %c0_32 = arith.constant 0 : index
      %32 = vector.load %arg8[%c0_31, %c0_32] : memref<8x32xf32, #tpu.memory_space<vmem>>, vector<8x32xf32>
      tpu.vector_store %arg8[%c0_31, %c0_32], %31 {strides = array<i32>} : memref<8x32xf32, #tpu.memory_space<vmem>>, vector<8x32xf32>,
    } else {
    }
    %c0 = arith.constant 0 : index
    %c0_1 = arith.constant 0 : index
    %c0_2 = arith.constant 0 : index
    %c0_3 = arith.constant 0 : index
    %c0_4 = arith.constant 0 : index
    %3 = vector.load %arg3[%c0, %c0_1, %c0_2, %c0_3, %c0_4] : memref<1x1x4x8x8xf32, #tpu.memory_space<vmem>>, vector<1x1x4x8x8xf32>
    %4 = vector.shape_cast %3 : vector<1x1x4x8x8xf32> to vector<4x8x8xf32>
    %c0_5 = arith.constant 0 : index
    %c0_6 = arith.constant 0 : index
    %c0_7 = arith.constant 0 : index
    %c0_8 = arith.constant 0 : index
    %c0_9 = arith.constant 0 : index
    %5 = vector.load %arg4[%c0_5, %c0_6, %c0_7, %c0_8, %c0_9] : memref<1x1x4x8x8xf32, #tpu.memory_space<vmem>>, vector<1x1x4x8x8xf32>
    %6 = vector.shape_cast %5 : vector<1x1x4x8x8xf32> to vector<4x8x8xf32>
    %c0_10 = arith.constant 0 : index
    %c0_11 = arith.constant 0 : index
    %c0_12 = arith.constant 0 : index
    %c0_13 = arith.constant 0 : index
    %c0_14 = arith.constant 0 : index
    %7 = vector.load %arg5[%c0_10, %c0_11, %c0_12, %c0_13, %c0_14] : memref<1x1x4x8x8xf32, #tpu.memory_space<vmem>>, vector<1x1x4x8x8xf32>
    %8 = vector.shape_cast %7 : vector<1x1x4x8x8xf32> to vector<4x8x8xf32>
    "tpu.trace_start"() <{level = 10 : i32, message = "gqd,gkd->gqk"}> : () -> ()
    %cst = arith.constant dense<0.000000e+00> : vector<4x8x8xf32>
    %9 = tpu.matmul %4, %6, %cst {dimension_numbers = #tpu.dot_dimension_numbers<[2], [2], [1], [1], [0, 0, 0, 1, 1, 1], [0], [0]>} : vector<4x8x8xf32>, vector<4x8x8xf32>, vector<4x8x8xf32> -> vector<4x8x8xf32>
    "tpu.trace_stop"() : () -> ()
    %cst_15 = arith.constant dense<0xFF800000> : vector<4x8xf32>
    %10 = vector.multi_reduction <maximumf>, %9, %cst_15 [2] : vector<4x8x8xf32> to vector<4x8xf32>
    %11 = vector.shape_cast %10 : vector<4x8xf32> to vector<4x8x1xf32>
    %12 = vector.broadcast %11 : vector<4x8x1xf32> to vector<4x8x8xf32>
    %13 = arith.subf %9, %12 : vector<4x8x8xf32>
    %14 = math.exp %13 : vector<4x8x8xf32>
    %cst_16 = arith.constant dense<0.000000e+00> : vector<4x8xf32>
    %15 = vector.multi_reduction <add>, %14, %cst_16 [2] : vector<4x8x8xf32> to vector<4x8xf32>
    %16 = vector.shape_cast %15 : vector<4x8xf32> to vector<4x8x1xf32>
    "tpu.trace_start"() <{level = 10 : i32, message = "gqk,gkd->gqd"}> : () -> ()
    %cst_17 = arith.constant dense<0.000000e+00> : vector<4x8x8xf32>
    %17 = tpu.matmul %14, %8, %cst_17 {dimension_numbers = #tpu.dot_dimension_numbers<[2], [1], [1], [2], [0, 0, 0, 1, 1, 2], [0], [0]>} : vector<4x8x8xf32>, vector<4x8x8xf32>, vector<4x8x8xf32> -> vector<4x8x8xf32>
    "tpu.trace_stop"() : () -> ()
    %18 = tpu.reciprocal %16 : vector<4x8x1xf32> -> vector<4x8x1xf32>
    %19 = vector.broadcast %18 : vector<4x8x1xf32> to vector<4x8x8xf32>
    %20 = arith.mulf %17, %19 : vector<4x8x8xf32>
    %c0_18 = arith.constant 0 : index
    %c0_19 = arith.constant 0 : index
    %c0_20 = arith.constant 0 : index
    %c0_21 = arith.constant 0 : index
    %21 = vector.load %arg6[%c0_18, %c0_19, %c0_20, %c0_21] : memref<1x4x8x32xf32, #tpu.memory_space<vmem>>, vector<1x4x8x32xf32>
    %22 = vector.shape_cast %21 : vector<1x4x8x32xf32> to vector<4x8x32xf32>
    "tpu.trace_start"() <{level = 10 : i32, message = "gqd,gdh->gqh"}> : () -> ()
    %cst_22 = arith.constant dense<0.000000e+00> : vector<4x8x32xf32>
    %23 = tpu.matmul %20, %22, %cst_22 {dimension_numbers = #tpu.dot_dimension_numbers<[2], [1], [1], [2], [0, 0, 0, 1, 1, 2], [0], [0]>} : vector<4x8x8xf32>, vector<4x8x32xf32>, vector<4x8x32xf32> -> vector<4x8x32xf32>
    "tpu.trace_stop"() : () -> ()
    %c0_23 = arith.constant 0 : index
    %c0_24 = arith.constant 0 : index
    %24 = vector.load %arg8[%c0_23, %c0_24] : memref<8x32xf32, #tpu.memory_space<vmem>>, vector<8x32xf32>
    %cst_25 = arith.constant dense<0.000000e+00> : vector<8x32xf32>
    %25 = vector.multi_reduction <add>, %23, %cst_25 [0] : vector<4x8x32xf32> to vector<8x32xf32>
    %26 = arith.addf %24, %25 : vector<8x32xf32>
    %c0_26 = arith.constant 0 : index
    %c0_27 = arith.constant 0 : index
    %27 = vector.load %arg8[%c0_26, %c0_27] : memref<8x32xf32, #tpu.memory_space<vmem>>, vector<8x32xf32>
    tpu.vector_store %arg8[%c0_26, %c0_27], %26 {strides = array<i32>} : memref<8x32xf32, #tpu.memory_space<vmem>>, vector<8x32xf32>,
    %c0_i32_28 = arith.constant 0 : i32
    %28 = arith.cmpi eq, %arg2, %c0_i32_28 : i32
    %29 = arith.extui %28 : i1 to i32
    %c0_i32_29 = arith.constant 0 : i32
    %30 = arith.cmpi ne, %29, %c0_i32_29 : i32
    scf.if %30 {
      %c0_30 = arith.constant 0 : index
      %c0_31 = arith.constant 0 : index
      %31 = vector.load %arg8[%c0_30, %c0_31] : memref<8x32xf32, #tpu.memory_space<vmem>>, vector<8x32xf32>
      %c0_32 = arith.constant 0 : index
      %c0_33 = arith.constant 0 : index
      %c0_34 = arith.constant 0 : index
      %32 = vector.load %arg7[%c0_32, %c0_33, %c0_34] : memref<1x8x32xf32, #tpu.memory_space<vmem>>, vector<1x8x32xf32>
      %33 = vector.shape_cast %32 : vector<1x8x32xf32> to vector<8x32xf32>
      %34 = vector.shape_cast %31 : vector<8x32xf32> to vector<1x8x32xf32>
      tpu.vector_store %arg7[%c0_32, %c0_33, %c0_34], %34 {strides = array<i32>} : memref<1x8x32xf32, #tpu.memory_space<vmem>>, vector<1x8x32xf32>,
    } else {
    }
    return
  }
  func.func @transform_0(%arg0: i32, %arg1: i32, %arg2: i32) -> (i32, i32, i32, i32, i32) {
    %c0_i32 = arith.constant 0 : i32
    %c0_i32_0 = arith.constant 0 : i32
    %c0_i32_1 = arith.constant 0 : i32
    return %arg0, %arg2, %c0_i32, %arg1, %c0_i32_0 : i32, i32, i32, i32, i32
  }
  func.func @transform_1(%arg0: i32, %arg1: i32, %arg2: i32) -> (i32, i32, i32, i32, i32) {
    %c0_i32 = arith.constant 0 : i32
    %c0_i32_0 = arith.constant 0 : i32
    %c0_i32_1 = arith.constant 0 : i32
    %c0_i32_2 = arith.constant 0 : i32
    return %arg0, %arg2, %c0_i32, %c0_i32_0, %c0_i32_1 : i32, i32, i32, i32, i32
  }
  func.func @transform_2(%arg0: i32, %arg1: i32, %arg2: i32) -> (i32, i32, i32, i32, i32) {
    %c0_i32 = arith.constant 0 : i32
    %c0_i32_0 = arith.constant 0 : i32
    %c0_i32_1 = arith.constant 0 : i32
    %c0_i32_2 = arith.constant 0 : i32
    return %arg0, %arg2, %c0_i32, %c0_i32_0, %c0_i32_1 : i32, i32, i32, i32, i32
  }
  func.func @transform_3(%arg0: i32, %arg1: i32, %arg2: i32) -> (i32, i32, i32, i32) {
    %c0_i32 = arith.constant 0 : i32
    %c0_i32_0 = arith.constant 0 : i32
    %c0_i32_1 = arith.constant 0 : i32
    %c0_i32_2 = arith.constant 0 : i32
    return %arg2, %c0_i32, %c0_i32_0, %c0_i32_1 : i32, i32, i32, i32
  }
  func.func @transform_4(%arg0: i32, %arg1: i32, %arg2: i32) -> (i32, i32, i32) {
    %c0_i32 = arith.constant 0 : i32
    %c0_i32_0 = arith.constant 0 : i32
    return %arg0, %arg1, %c0_i32 : i32, i32, i32
  }
}

</mosaic_0001>

<bundles_post_ra>
// kernel: tpu_custom_call.1
= control target key start
LH: loop header
LB: loop body
LE: loop exit
PB: predicated region body
PF: predicated region fallthrough
CT: control target
= control target key end

     0   :  { %s2352_s0 = inlined_call_operand.hbm [shape: f32[2,1,4,8,8], index: 0, kind: input, shape index: {}]   ;;  %s2353_s1 = inlined_call_operand.hbm [shape: f32[2,1,4,8,8], index: 1, kind: input, shape index: {}]   ;;  %s2354_s2 = inlined_call_operand.hbm [shape: f32[2,1,4,8,8], index: 2, kind: input, shape index: {}]   ;;  %s2355_s3 = inlined_call_operand.hbm [shape: f32[1,4,8,32], index: 3, kind: input, shape index: {}]   ;;  %s2356_s4 = inlined_call_operand.hbm [shape: f32[2,8,32], index: 4, kind: output, shape index: {}]  }
   0x1   :  { %2374 = sst [smem:[#allocation20_spill]] %s2352_s0 }
   0x2   :  { %2375 = sst [smem:[#allocation21_spill]] %s2353_s1 }
   0x3   :  { %9 = vsyncpa [#allocation4], 0 }
   0x4   :  { %11 = vsyncpa [#allocation4 + $0x1], 0 }
   0x5   :  { %12 = vsyncpa [#allocation7], 0 }
   0x6   :  { %14 = vsyncpa [#allocation7 + $0x1], 0 }
   0x7   :  { %15 = vsyncpa [#allocation10], 0 }
   0x8   :  { %16 = vsyncpa [#allocation5], 0 }
   0x9   :  { %18 = vsyncpa [#allocation5 + $0x1], 0  ;;  %s1959_s15 = smov 0   ;;  %s1961_s16 = smov 0  }
   0xa   :  { %s1963_s17 = smov 0   ;;  %s1965_s18 = smov 0  }
   0xb   :  { %s1967_s19 = smov 0   ;;  %s1969_s20 = smov 0  }
   0xc LB: > { %2376 = sst [smem:[#allocation16_spill]] %s1911_s17  ;;  %s43_s21 = sadd.s32 1, %s1919_s19  ;;  %s1923_s20 = sphi %s1969_s20, %s24_s20   ;;  %s1919_s19 = sphi %s1967_s19, %s2406_s19   ;;  %s1915_s18 = sphi %s1965_s18, %s2405_s18   ;;  %s1911_s17 = sphi %s1963_s17, %s2404_s17   ;;  %s1907_s16 = sphi %s1961_s16, %s2408_s16   ;;  %s1903_s15 = sphi %s1959_s15, %s2407_s15  }
   0xd   : > { %2377 = sst [smem:[#allocation17_spill]] %s1919_s19  ;;  %s54_s22 = sadd.s32 1, %s1911_s17 }
   0xe   : > { %p45_p0 = scmp.ge.s32.totalorder %s43_s21, 2  ;;  %p2357_p1 = scmp.ne.s32.totalorder %s1911_s17, %s1907_s16 }
   0xf   : > { %p62_p2 = scmp.eq.s32.totalorder %s1923_s20, 0  ;;  %p1643_p6 = scmp.lt.s32.totalorder %s1923_s20, 2 }
  0x10   : > { %s2410_s21 = smov (%p45_p0, %s43_s21), 0  ;;  %s2362_s24 = sand.u32 1, %s1911_s17  }
  0x11   : > { %2378 = sst [smem:[#allocation18_spill]] %s2410_s21  ;;  %p63_p3 = por %p62_p2, %p2357_p1 }
  0x12   : > { %s47_s23 = ssub.s32 %s1919_s19, %s2410_s21  ;;  %s2005_s25 = sshll.u32 %s1919_s19, 9 }
  0x13   : > { %p52_p5 = scmp.eq.s32.totalorder %s47_s23, 0  ;;  %s2012_s27 = sshll.u32 %s2362_s24, 5 }
  0x14   : > { %p2014_p7 = pnand %p1643_p6, %p63_p3  ;;  %s241_s29 = sand.u32 1, %s1923_s20  }
  0x15   : > { %s2008_s26 = scalar_select %p52_p5, %s1911_s17, %s54_s22  }
  0x16   : > { %s2380_s28 = scalar_select %p2014_p7, 1, 0 }
  0x17   : > { %2379 = sst [smem:[#allocation19_spill]] %s2008_s26  ;;  %s2381_s1 = sld [smem:[#allocation21_spill]] }
  0x18   : > { %s245_s7 = scalar_lea.vmem [#allocation6], %s2012_s27  ;;  %s2028_s9 = scalar_lea.sflag [#allocation7], %s241_s29 }
  0x19   : > { %s254_s8 = sshll.u32 %s245_s7, 4  ;;  %p2034_p9 = pneg %p2014_p7  ;;  %s2026_s8 = int_to_ptr.vmem [resolvable:$true] %s254_s8 }
  0x1b   : > { %s2382_s11 = scalar_select %p2034_p9, 1, 0 }
  0x1d   : > { %s2023_s6 = scalar_lea.hbm %s2381_s1, %s2005_s25  ;;  %s1720_s14 = scalar_lea.hbm %s2381_s1, 1024 }
  0x1e   : > { %s1715_s10 = scalar_lea.hbm %s2023_s6, 512  ;;  %p1721_p12 = scmp.lt.u32.totalorder %s2023_s6, %s2381_s1 }
  0x1f   : > { %p1716_p8 = scmp.ne.s32.totalorder %s2023_s6, %s1715_s10  ;;  %p1722_p13 = scmp.lt.u32.totalorder %s1720_s14, %s1715_s10 }
  0x20   : > { %p1724_p2 = scmp.lt.u32.totalorder %s1715_s10, %s2023_s6 }
  0x21   : > { %p1718_p10 = pnand %p2034_p9, %p1716_p8  ;;  %p1723_p0 = por %p1722_p13, %p1721_p12 }
  0x23   : > { %p1719_p11 = pneg %p1718_p10  ;;  %p1725_p3 = por %p1724_p2, %p1723_p0 }
  0x25   : > { %p1726_p5 = pnand %p1725_p3, %p1719_p11 }
  0x27   : > { %1729 = shalt.err (!%p1726_p5)
}
  0x28   : > { %s1730_s29 = scalar_lea.vmem %s2026_s8, 512  ;;  %s1925_s30 = smov [#allocation6]  }
  0x29   : > { %p1731_p6 = scmp.ne.s32.totalorder %s2026_s8, %s1730_s29  ;;  %s1735_s5 = sshll.u32 %s1925_s30, 4  ;;  %s1736_s5 = int_to_ptr.vmem [resolvable:$false] %s1735_s5 }
  0x2a   : > { %s1737_s7 = scalar_lea.vmem %s1736_s5, 1024  ;;  %p1738_p4 = scmp.lt.s32.totalorder %s2026_s8, %s1736_s5 }
  0x2b   : > { %p1733_p8 = pnand %p1731_p6, %p2034_p9  ;;  %p1739_p1 = scmp.lt.s32.totalorder %s1737_s7, %s1730_s29 }
  0x2d   : > { %p1734_p10 = pneg %p1733_p8  ;;  %p1740_p12 = por %p1739_p1, %p1738_p4 }
  0x2f   : > { %p1741_p13 = pnand %p1740_p12, %p1734_p10 }
  0x31   : > { %1744 = shalt.err (!%p1741_p13)
}
  0x32   : > { %s2358_s10 = smov 128   ;;  %s2360_s12 = smov 8  }
  0x33   : > { %1634 = dma.hbm_to_vmem [thread:$0]  (!%p2014_p7), %s2023_s6, 512, %s2026_s8, %s2028_s9, %s2358_s10, %s2358_s10, %s2360_s12  }
  0x34   : > { %s2062_s13 = sadd.s32 4294967295, %s1923_s20   ;;  %s1486_s14 = sadd.s32 4294967294, %s1923_s20  }
  0x35   : > { %p67_p1 = scmp.ne.s32.totalorder %s1907_s16, %s1903_s15  ;;  %p2365_p4 = scmp.eq.s32.totalorder %s2062_s13, 0 }
  0x36   : > { %p175_p11 = scmp.eq.s32.totalorder %s2062_s13, 1  ;;  %p181_p0 = scmp.eq.s32.totalorder %s1486_s14, 1 }
  0x37   : > { %p1487_p2 = scmp.ge.s32.totalorder %s1923_s20, 1  ;;  %p2072_p3 = por %p2365_p4, %p67_p1 }
  0x38   : > { %p2384_p5 = scmp.ne.s32.totalorder %s1911_s17, %s1907_s16  ;;  %p2083_p8 = por %p181_p0, %p67_p1 }
  0x39   : > { %s2383_s22 = scalar_select %p2072_p3, 1, 0 }
  0x3a   : > { %p2079_p6 = por %p175_p11, %p2384_p5  ;;  %p188_p10 = scmp.lt.s32.totalorder %s1923_s20, 3 }
  0x3b   : > { %s2386_s8 = scalar_select %p2083_p8, 1, 0 }
  0x3c   : > { %s2385_s6 = scalar_select %p2079_p6, 1, 0 }
  0x3d   : > { %p2088_p12 = pnand %p1487_p2, %p188_p10  ;;  %s1928_s29 = smov [#allocation9]  }
  0x3e   : > { %s203_s30 = sshll.u32 %s1928_s29, 4  ;;  %s2388_s0 = sld [smem:[#allocation20_spill]]  ;;  %s2092_s30 = int_to_ptr.vmem [resolvable:$true] %s203_s30 }
  0x3f   : > { %s2387_s23 = scalar_select %p2088_p12, 1, 0 }
  0x40   : > { %p1624_p13 = pneg %p2088_p12  ;;  %s221_s10 = scalar_lea.vmem [#allocation3], %s2012_s27 }
  0x41   : > { %s231_s12 = sshll.u32 %s221_s10, 4  ;;  %s2390_s29 = sand.u32 1, %s1911_s17   ;;  %s2109_s12 = int_to_ptr.vmem [resolvable:$true] %s231_s12 }
  0x42   : > { %p2105_p1 = pnand %p1624_p13, %p2365_p4  ;;  %s2113_s1 = scalar_lea.sflag [#allocation4], %s2390_s29 }
  0x44   : > { %s2100_s14 = scalar_lea.hbm %s2388_s0, %s2005_s25  ;;  %s1750_s19 = scalar_lea.hbm %s2388_s0, 1024 }
  0x45   : > { %s2389_s24 = scalar_select %p2105_p1, 1, 0 }
  0x46   : > { %s1745_s21 = scalar_lea.hbm %s2100_s14, 512  ;;  %p1751_p5 = scmp.lt.u32.totalorder %s2100_s14, %s2388_s0 }
  0x47   : > { %p1746_p11 = scmp.ne.s32.totalorder %s2100_s14, %s1745_s21  ;;  %p1752_p10 = scmp.lt.u32.totalorder %s1750_s19, %s1745_s21 }
  0x48   : > { %p1754_p4 = scmp.lt.u32.totalorder %s1745_s21, %s2100_s14 }
  0x49   : > { %p1748_p0 = pnand %p1746_p11, %p2034_p9  ;;  %p1753_p13 = por %p1752_p10, %p1751_p5 }
  0x4b   : > { %p1749_p2 = pneg %p1748_p0  ;;  %p1755_p8 = por %p1754_p4, %p1753_p13 }
  0x4d   : > { %p1756_p6 = pnand %p1755_p8, %p1749_p2 }
  0x4f   : > { %1759 = shalt.err (!%p1756_p6)
}
  0x50   : > { %s1760_s29 = scalar_lea.vmem %s2109_s12, 512  ;;  %s1929_s5 = smov [#allocation3]  }
  0x51   : > { %p1761_p11 = scmp.ne.s32.totalorder %s2109_s12, %s1760_s29  ;;  %s1765_s7 = sshll.u32 %s1929_s5, 4  ;;  %s1766_s7 = int_to_ptr.vmem [resolvable:$false] %s1765_s7 }
  0x52   : > { %s1767_s26 = scalar_lea.vmem %s1766_s7, 1024  ;;  %p1768_p12 = scmp.lt.s32.totalorder %s2109_s12, %s1766_s7 }
  0x53   : > { %p1763_p0 = pnand %p1761_p11, %p2034_p9  ;;  %p1769_p1 = scmp.lt.s32.totalorder %s1767_s26, %s1760_s29 }
  0x55   : > { %p1764_p3 = pneg %p1763_p0  ;;  %p1770_p5 = por %p1769_p1, %p1768_p12 }
  0x57   : > { %p1771_p10 = pnand %p1770_p5, %p1764_p3 }
  0x59   : > { %1774 = shalt.err (!%p1771_p10)
}
  0x5a   : > { %s2391_s19 = smov 8   ;;  %s2392_s21 = smov 128  }
  0x5b   : > { %1631 = dma.hbm_to_vmem [thread:$0]  (!%p2014_p7), %s2100_s14, 512, %s2109_s12, %s2113_s1, %s2392_s21, %s2392_s21, %s2391_s19  }
  0x5c   : > { %s1775_s5 = scalar_lea.hbm %s2355_s3, 512  ;;  %p2393_p3 = scmp.ne.s32.totalorder %s2389_s24, 0 }
  0x5d   : > { %p1776_p4 = scmp.ne.s32.totalorder %s2355_s3, %s1775_s5  ;;  %p1782_p1 = scmp.lt.u32.totalorder %s1775_s5, %s2355_s3 }
  0x5e   : > { %p1777_p6 = pneg %p2393_p3 }
  0x60   : > { %p1778_p8 = pnand %p1777_p6, %p1776_p4 }
  0x62   : > { %p1779_p12 = pneg %p1778_p8 }
  0x64   : > { %p1784_p2 = pnand %p1782_p1, %p1779_p12 }
  0x66   : > { %1787 = shalt.err (!%p1784_p2)
}
  0x67   : > { %s1788_s1 = scalar_lea.vmem %s2092_s30, 512  ;;  %p1796_p5 = scmp.lt.s32.totalorder %s2092_s30, %s2092_s30 }
  0x68   : > { %p1789_p13 = scmp.ne.s32.totalorder %s2092_s30, %s1788_s1  ;;  %p1797_p10 = scmp.lt.s32.totalorder %s1788_s1, %s1788_s1 }
  0x6a   : > { %p1791_p11 = pnand %p1789_p13, %p1777_p6  ;;  %p1798_p7 = por %p1797_p10, %p1796_p5 }
  0x6c   : > { %p1792_p0 = pneg %p1791_p11 }
  0x6e   : > { %p1799_p9 = pnand %p1798_p7, %p1792_p0 }
  0x70   : > { %1802 = shalt.err (!%p1799_p9)
}
  0x71   : > { %1627 = dma.hbm_to_vmem [thread:$0]  (!%p2393_p3), %s2355_s3, 512, %s2092_s30, [#allocation10], %s2392_s21, %s2392_s21, %s2391_s19  }
  0x72   : > { %s2168_s10 = scalar_lea.hbm %s2354_s2, %s2005_s25  ;;  %s268_s24 = scalar_lea.vmem [#allocation8], %s2012_s27 }
  0x73   : > { %s277_s5 = sshll.u32 %s268_s24, 4  ;;  %s1803_s7 = scalar_lea.hbm %s2168_s10, 512  ;;  %s2171_s5 = int_to_ptr.vmem [resolvable:$true] %s277_s5 }
  0x74   : > { %p1804_p7 = scmp.ne.s32.totalorder %s2168_s10, %s1803_s7  ;;  %p2394_p9 = scmp.ne.s32.totalorder %s2382_s11, 0 }
  0x75   : > { %s1808_s26 = scalar_lea.hbm %s2354_s2, 1024  ;;  %p1809_p3 = scmp.lt.u32.totalorder %s2168_s10, %s2354_s2 }
  0x76   : > { %p1806_p4 = pnand %p1804_p7, %p2394_p9  ;;  %p1810_p8 = scmp.lt.u32.totalorder %s1808_s26, %s1803_s7 }
  0x77   : > { %p1812_p1 = scmp.lt.u32.totalorder %s1803_s7, %s2168_s10 }
  0x78   : > { %p1807_p6 = pneg %p1806_p4  ;;  %p1811_p12 = por %p1810_p8, %p1809_p3 }
  0x7a   : > { %p1813_p2 = por %p1812_p1, %p1811_p12 }
  0x7c   : > { %p1814_p13 = pnand %p1813_p2, %p1807_p6 }
  0x7e   : > { %1817 = shalt.err (!%p1814_p13)
}
  0x7f   : > { %s1818_s27 = scalar_lea.vmem %s2171_s5, 512  ;;  %s1930_s0 = smov [#allocation8]  }
  0x80   : > { %p1819_p11 = scmp.ne.s32.totalorder %s2171_s5, %s1818_s27  ;;  %s1823_s17 = sshll.u32 %s1930_s0, 4  ;;  %s1824_s17 = int_to_ptr.vmem [resolvable:$false] %s1823_s17 }
  0x81   : > { %s1825_s12 = scalar_lea.vmem %s1824_s17, 1024  ;;  %p1826_p10 = scmp.lt.s32.totalorder %s2171_s5, %s1824_s17 }
  0x82   : > { %p1821_p0 = pnand %p1819_p11, %p2394_p9  ;;  %p1827_p7 = scmp.lt.s32.totalorder %s1825_s12, %s1818_s27 }
  0x84   : > { %p1822_p5 = pneg %p1821_p0  ;;  %p1828_p4 = por %p1827_p7, %p1826_p10 }
  0x86   : > { %p1829_p3 = pnand %p1828_p4, %p1822_p5 }
  0x88   : > { %1832 = shalt.err (!%p1829_p3)
}
  0x89   : > { %p2395_p6 = scmp.ne.s32.totalorder %s2380_s28, 0  ;;  %p2396_p9 = scmp.ne.s32.totalorder %s2387_s23, 0 }
  0x8a   : > { %s2201_s11 = sand.u32 (!%p2396_p9), 1, %s1907_s16   ;;  %p2397_p8 = scmp.ne.s32.totalorder (!%p2396_p9), %s2383_s22, 0 }
  0x8b   : > { %1637 = dma.hbm_to_vmem [thread:$0]  (!%p2395_p6), %s2168_s10, 512, %s2171_s5, %s2028_s9, %s2392_s21, %s2392_s21, %s2391_s19  }
  0x8c   : > { %289 = sbr.rel (%p2396_p9) target bundleno = 991 (0x3df), region = 36  ;;  %s1500_s14 = sshll.u32 (!%p2396_p9), %s2201_s11, 5 }
  0x8d   : > { %s292_s24 = scalar_lea.sflag (!%p2396_p9), [#allocation4], %s2201_s11  ;;  %s2205_s7 = scalar_lea.vmem (!%p2396_p9), [#allocation3], %s1500_s14 }
  0x93   : > { %1886 = dma.done.wait (%p2397_p8), %s292_s24, 512  }
  0x94   : > { %1888 = vsyncadd (%p2397_p8), %s292_s24, 4294966784  ;;  %s300_s28 = sand.u32 1, %s2062_s13   ;;  %s304_s23 = scalar_lea.vmem [#allocation6], %s1500_s14 }
  0x95   : > { %s301_s9 = scalar_lea.sflag [#allocation7], %s300_s28 }
  0x96   : > { %1890 = dma.done.wait (%p2397_p8), %s301_s9, 1024  }
  0x97   : > { %1892 = vsyncadd (%p2397_p8), %s301_s9, 4294966272  ;;  %s2216_s19 = scalar_lea.vmem [#allocation8], %s1500_s14  ;;  %p2398_p12 = scmp.eq.s32.totalorder %s2062_s13, 0 }
  0x99   : > { %1894 = dma.done.wait (%p2398_p12), [#allocation10], 512   ;;  %p2399_p1 = pmov %p2398_p12 }
  0x9a   : > { %v1931_v0 = vmov 0.0   ;;  %vm1932_vm0 = vmmov 0   ;;  %vm370_vm1 = vcmask 64512   ;;  %v362_v1 = vld [vmem:[%s304_s23] sm:$0xff]  ;;  %v363_v2 = vld [vmem:[%s304_s23 + $0x8] sm:$0xff]  ;;  %v364_v5 = vld [vmem:[%s304_s23 + $0x10] sm:$0xff] }
  0x9b   : > { %1896 = vsyncadd (%p2399_p1), [#allocation10], 4294966784  ;;  %1552 = vmatprep.subr.mxu0 %v1931_v0  ;;  %1554 = vmatprep.mubr.msk.f32.mxu0 %vm1932_vm0, %v1931_v0  ;;  %v358_v3 = vld [vmem:[%s2205_s7] sm:$0xff]  ;;  %v359_v4 = vld [vmem:[%s2205_s7 + $0x8] sm:$0xff]  ;;  %vm356_vm2 = vcmask 261120   ;;  %s1504_s13 = sshll.u32 %s2201_s11, 3 }
  0x9c   : > { %1557 = vmatprep.subr.mxu1 %v1931_v0  ;;  %1559 = vmatprep.mubr.msk.f32.mxu1 %vm1932_vm0, %v1931_v0  ;;  %v365_v6 = vld [vmem:[%s304_s23 + $0x18] sm:$0xff]  ;;  %v360_v7 = vld [vmem:[%s2205_s7 + $0x10] sm:$0xff]  ;;  %v366_v21 = vld [vmem:[%s2216_s19] sm:$0xff]  ;;  %357 = vst.msk [vmem:[#allocation2] sm:$0xff] %vm356_vm2, %v1931_v0  ;;  %s1522_s22 = sshll.u32 %s1915_s18, 7  ;;  %s351_s21 = scalar_lea.vmem [#allocation11], %s1504_s13 }
  0x9d   : > { %1553 = vmatpush3.xpose.msk.msra.mxu0 %vm370_vm1, %v362_v1  ;;  %1558 = vmatpush3.xpose.msk.msra.mxu1 %vm370_vm1, %v363_v2  ;;  %v361_v8 = vld [vmem:[%s2205_s7 + $0x18] sm:$0xff]  ;;  %v367_v22 = vld [vmem:[%s2216_s19 + $0x8] sm:$0xff]  ;;  %v368_v35 = vld [vmem:[%s2216_s19 + $0x10] sm:$0xff]  ;;  %s1338_s10 = sshll.u32 %s351_s21, 4  ;;  %s2302_s30 = scalar_lea.hbm %s2356_s4, %s1522_s22  ;;  %s2304_s10 = int_to_ptr.vmem [resolvable:$true] %s1338_s10 }
  0x9e   : > { %1562 = vmatprep.subr.mxu0 %v1931_v0  ;;  %1567 = vmatprep.subr.mxu1 %v1931_v0  ;;  %v369_v38 = vld [vmem:[%s2216_s19 + $0x18] sm:$0xff]  ;;  %v1011_v45 = vld [vmem:[#allocation9] sm:$0xff]  ;;  %v1012_v46 = vld [vmem:[#allocation9 + $0x8] sm:$0xff]  ;;  %s1324_s26 = scalar_lea.sflag [#allocation5], %s2201_s11  ;;  %s1833_s1 = scalar_lea.vmem %s2304_s10, 128 }
  0x9f   : > { %v1013_v55 = vld [vmem:[#allocation9 + $0x10] sm:$0xff]  ;;  %v1014_v62 = vld [vmem:[#allocation9 + $0x18] sm:$0xff]  ;;  %p1834_p2 = scmp.ne.s32.totalorder %s2304_s10, %s1833_s1  ;;  %p2400_p13 = scmp.ne.s32.totalorder %s2385_s6, 0 }
  0xa0   : > { %1555 = vmatmul.mubr.msk.f32.vlgmr.msra.gmra.mrb[0].mxu0 %vm370_vm1, %v358_v3  ;;  %1560 = vmatmul.mubr.msk.f32.vlgmr.msra.gmra.mrb[0].mxu1 %vm370_vm1, %v359_v4  ;;  %s1933_s18 = smov [#allocation11]  }
  0xa1   : > { %1563 = vmatpush3.xpose.msk.msra.mxu0 %vm370_vm1, %v364_v5  ;;  %1564 = vmatprep.mubr.msk.f32.mxu0 %vm1932_vm0, %v1931_v0  ;;  %p1835_p11 = pnand %p1834_p2, %p2400_p13  ;;  %s1837_s25 = sshll.u32 %s1933_s18, 4  ;;  %s1838_s25 = int_to_ptr.vmem [resolvable:$false] %s1837_s25 }
  0xa2   : > { %1568 = vmatpush3.xpose.msk.msra.mxu1 %vm370_vm1, %v365_v6  ;;  %1569 = vmatprep.mubr.msk.f32.mxu1 %vm1932_vm0, %v1931_v0  ;;  %s1839_s27 = scalar_lea.vmem %s1838_s25, 256  ;;  %p1840_p5 = scmp.lt.s32.totalorder %s2304_s10, %s1838_s25 }
  0xa3   : > { %1572 = vmatprep.subr.mxu0 %v1931_v0  ;;  %1577 = vmatprep.subr.mxu1 %v1931_v0  ;;  %p1836_p0 = pneg %p1835_p11  ;;  %p1841_p10 = scmp.lt.s32.totalorder %s1839_s27, %s1833_s1 }
  0xa4   : > { %1565 = vmatmul.mubr.msk.f32.vlgmr.msra.gmra.mrb[2].mxu0 %vm370_vm1, %v360_v7 }
  0xa5   : > { %1570 = vmatmul.mubr.msk.f32.vlgmr.msra.gmra.mrb[2].mxu1 %vm370_vm1, %v361_v8  ;;  %1574 = vmatprep.mubr.msk.f32.mxu0 %vm1932_vm0, %v1931_v0  ;;  %p1842_p7 = por %p1841_p10, %p1840_p5 }
  0xa6   : > { %1579 = vmatprep.mubr.msk.f32.mxu1 %vm1932_vm0, %v1931_v0  ;;  %1573 = vmatpush3.msra.mxu0 %v366_v21 }
  0xa7   : > { %1582 = vmatprep.subr.mxu0 %v1931_v0  ;;  %1578 = vmatpush3.msra.mxu1 %v367_v22  ;;  %p1843_p4 = pnand %p1842_p7, %p1836_p0 }
  0xa8   : > { %1587 = vmatprep.subr.mxu1 %v1931_v0 }
 0x173   : > { %v443_v9 = vpop.f32.mrb[0].mxu0  ;;  %v519_v10 = vpop.f32.mrb[0].mxu1 }
 0x174   : > { %v1556_v11 = vpop.f32.mrb[1].mxu0  ;;  %v675_v12 = vsel %vm370_vm1, %v443_v9, -inf  ;;  %v1561_v13 = vpop.f32.mrb[1].mxu1  ;;  %v678_v14 = vsel %vm370_vm1, %v519_v10, -inf }
 0x175   : > { %676 = vmax.xlane.f32.xlu0 %v675_v12 }
 0x177   : > { %v595_v15 = vpop.f32.mrb[2].mxu0 }
 0x178   : > { %v1566_v16 = vpop.f32.mrb[3].mxu0  ;;  %v681_v17 = vsel %vm370_vm1, %v595_v15, -inf  ;;  %v671_v18 = vpop.f32.mrb[2].mxu1 }
 0x179   : > { %679 = vmax.xlane.f32.xlu0 %v678_v14  ;;  %682 = vmax.xlane.f32.xlu1 %v681_v17  ;;  %v1571_v19 = vpop.f32.mrb[3].mxu1  ;;  %v684_v20 = vsel %vm370_vm1, %v671_v18, -inf  ;;  %v1307_v17 = vld [vmem:[#allocation2] sm:$0xff] }
 0x17d   : > { %685 = vmax.xlane.f32.xlu1 %v684_v20 }
 0x202   : > { %v677_v23 = vpop.xlane.xlu0 %676 }
 0x203   : > { %v687_v24 = vsub.f32 %v443_v9, %v677_v23 }
 0x205   : > { %v691_v25 = vmul.f32 1.442695, %v687_v24 }
 0x206   : > { %v680_v26 = vpop.xlane.xlu0 %679  ;;  %v683_v27 = vpop.xlane.xlu1 %682 }
 0x207   : > { %1699 = vpow2.f32 %v691_v25  ;;  %v688_v28 = vsub.f32 %v519_v10, %v680_v26  ;;  %v689_v29 = vsub.f32 %v595_v15, %v683_v27 }
 0x209   : > { %v693_v30 = vmul.f32 1.442695, %v688_v28  ;;  %v695_v31 = vmul.f32 1.442695, %v689_v29 }
 0x20a   : > { %v686_v32 = vpop.xlane.xlu1 %685 }
 0x20b   : > { %1701 = vpow2.f32 %v693_v30  ;;  %v690_v33 = vsub.f32 %v671_v18, %v686_v32 }
 0x20c   : > { %1703 = vpow2.f32 %v695_v31 }
 0x20d   : > { %v697_v34 = vmul.f32 1.442695, %v690_v33 }
 0x20f   : > { %1705 = vpow2.f32 %v697_v34 }
 0x211   : > { %v1700_v36 = vpop.eup %1699 }
 0x212   : > { %1575 = vmatmul.mubr.msk.f32.vlgmr.msra.gmra.mrb[4].mxu0 %vm370_vm1, %v1700_v36  ;;  %v699_v37 = vsel %vm370_vm1, %v1700_v36, 0.0 }
 0x213   : > { %700 = vadd.xlane.f32.xlu0 %v699_v37  ;;  %1583 = vmatpush3.msra.mxu0 %v368_v35 }
 0x214   : > { %1584 = vmatprep.mubr.msk.f32.mxu0 %vm1932_vm0, %v1931_v0  ;;  %1592 = vmatprep.subr.mxu0 %v1931_v0 }
 0x215   : > { %v1702_v39 = vpop.eup %1701 }
 0x216   : > { %v1704_v40 = vpop.eup %1703  ;;  %1580 = vmatmul.mubr.msk.f32.vlgmr.msra.gmra.mrb[4].mxu1 %vm370_vm1, %v1702_v39  ;;  %v702_v41 = vsel %vm370_vm1, %v1702_v39, 0.0 }
 0x217   : > { %1585 = vmatmul.mubr.msk.f32.vlgmr.msra.gmra.mrb[6].mxu0 %vm370_vm1, %v1704_v40  ;;  %1588 = vmatpush3.msra.mxu1 %v369_v38  ;;  %v705_v42 = vsel %vm370_vm1, %v1704_v40, 0.0 }
 0x218   : > { %703 = vadd.xlane.f32.xlu1 %v702_v41  ;;  %706 = vadd.xlane.f32.xlu0 %v705_v42 }
 0x219   : > { %v1706_v43 = vpop.eup %1705  ;;  %1589 = vmatprep.mubr.msk.f32.mxu1 %vm1932_vm0, %v1931_v0  ;;  %1594 = vmatprep.mubr.msk.f32.mxu0 %vm1932_vm0, %v1931_v0 }
 0x21a   : > { %1590 = vmatmul.mubr.msk.f32.vlgmr.msra.gmra.mrb[6].mxu1 %vm370_vm1, %v1706_v43  ;;  %v708_v44 = vsel %vm370_vm1, %v1706_v43, 0.0  ;;  %1597 = vmatprep.subr.mxu1 %v1931_v0 }
 0x21b   : > { %1599 = vmatprep.mubr.msk.f32.mxu1 %vm1932_vm0, %v1931_v0  ;;  %1593 = vmatpush3.msra.mxu0 %v1011_v45 }
 0x21c   : > { %709 = vadd.xlane.f32.xlu1 %v708_v44  ;;  %1602 = vmatprep.subr.mxu0 %v1931_v0 }
 0x21d   : > { %1598 = vmatpush3.msra.mxu1 %v1012_v46 }
 0x21e   : > { %1607 = vmatprep.subr.mxu1 %v1931_v0 }
 0x2a0   : > { %v701_v47 = vpop.xlane.xlu0 %700 }
 0x2a1   : > { %1707 = vrcp.f32 %v701_v47 }
 0x2a5   : > { %v704_v48 = vpop.xlane.xlu1 %703  ;;  %v707_v49 = vpop.xlane.xlu0 %706 }
 0x2a6   : > { %1709 = vrcp.f32 %v704_v48 }
 0x2a7   : > { %1711 = vrcp.f32 %v707_v49 }
 0x2a9   : > { %v710_v50 = vpop.xlane.xlu1 %709 }
 0x2aa   : > { %1713 = vrcp.f32 %v710_v50 }
 0x2ab   : > { %v1708_v51 = vpop.eup %1707 }
 0x2b0   : > { %v1710_v56 = vpop.eup %1709 }
 0x2b1   : > { %v1712_v58 = vpop.eup %1711 }
 0x2b4   : > { %v1714_v2 = vpop.eup %1713 }
 0x2e5   : > { %v780_v52 = vpop.f32.mrb[4].mxu0 }
 0x2e6   : > { %v1007_v53 = vmul.f32 %v1708_v51, %v780_v52  ;;  %v1576_v54 = vpop.f32.mrb[5].mxu0 }
 0x2e8   : > { %1595 = vmatmul.mubr.msk.f32.vlgmr.msra.gmra.mrb[8].mxu0 %vm370_vm1, %v1007_v53 }
 0x2e9   : > { %v853_v57 = vpop.f32.mrb[4].mxu1  ;;  %1603 = vmatpush3.msra.mxu0 %v1013_v55  ;;  %1604 = vmatprep.mubr.msk.f32.mxu0 %vm1932_vm0, %v1931_v0 }
 0x2ea   : > { %v1008_v59 = vmul.f32 %v1710_v56, %v853_v57  ;;  %v926_v60 = vpop.f32.mrb[6].mxu0  ;;  %v1581_v61 = vpop.f32.mrb[5].mxu1 }
 0x2eb   : > { %v1009_v63 = vmul.f32 %v1712_v58, %v926_v60  ;;  %v1586_v1 = vpop.f32.mrb[7].mxu0 }
 0x2ec   : > { %1600 = vmatmul.mubr.msk.f32.vlgmr.msra.gmra.mrb[8].mxu1 %vm370_vm1, %v1008_v59 }
 0x2ed   : > { %1605 = vmatmul.mubr.msk.f32.vlgmr.msra.gmra.mrb[10].mxu0 %vm370_vm1, %v1009_v63  ;;  %v999_v3 = vpop.f32.mrb[6].mxu1  ;;  %1608 = vmatpush3.msra.mxu1 %v1014_v62 }
 0x2ee   : > { %v1010_v4 = vmul.f32 %v1714_v2, %v999_v3  ;;  %v1591_v5 = vpop.f32.mrb[7].mxu1  ;;  %1609 = vmatprep.mubr.msk.f32.mxu1 %vm1932_vm0, %v1931_v0 }
 0x2f0   : > { %1610 = vmatmul.mubr.msk.f32.vlgmr.msra.gmra.mrb[10].mxu1 %vm370_vm1, %v1010_v4 }
 0x3bb   : > { %v1084_v6 = vpop.f32.mrb[8].mxu0 }
 0x3bc   : > { %v1596_v7 = vpop.f32.mrb[9].mxu0  ;;  %v1309_v9 = vsel %vm356_vm2, %v1084_v6, 0.0 }
 0x3bf   : > { %v1157_v8 = vpop.f32.mrb[8].mxu1 }
 0x3c0   : > { %v1310_v10 = vsel %vm356_vm2, %v1157_v8, 0.0  ;;  %v1230_v11 = vpop.f32.mrb[10].mxu0  ;;  %v1601_v12 = vpop.f32.mrb[9].mxu1 }
 0x3c1   : > { %v1311_v13 = vadd.f32 %v1310_v10, %v1309_v9  ;;  %v1606_v14 = vpop.f32.mrb[11].mxu0  ;;  %v1312_v15 = vsel %vm356_vm2, %v1230_v11, 0.0 }
 0x3c3   : > { %v1313_v16 = vadd.f32 %v1312_v15, %v1311_v13  ;;  %v1303_v0 = vpop.f32.mrb[10].mxu1 }
 0x3c4   : > { %v1314_v18 = vsel %vm356_vm2, %v1303_v0, 0.0  ;;  %v1611_v19 = vpop.f32.mrb[11].mxu1 }
 0x3c5   : > { %v1315_v20 = vadd.f32 %v1314_v18, %v1313_v16 }
 0x3c7   : > { %v1316_v21 = vadd.f32 %v1315_v20, %v1307_v17 }
 0x3c9   : > { %1317 = vst.msk [vmem:[#allocation2] sm:$0xff] %vm356_vm2, %v1316_v21 }
 0x3d0   : > { %v1321_v22 = vld [vmem:[#allocation2] sm:$0xff] }
 0x3d1   : > { %1322 = vst.msk [vmem:[%s351_s21] sm:$0xff] %vm356_vm2, %v1321_v22 }
 0x3d2   : > { %1846 = shalt.err (!%p1843_p4)
}
 0x3d3   : > { %s1847_s0 = scalar_lea.hbm %s2302_s30, 128  ;;  %s1851_s11 = scalar_lea.hbm %s2356_s4, 256 }
 0x3d4   : > { %p1848_p3 = scmp.ne.s32.totalorder %s2302_s30, %s1847_s0  ;;  %p1852_p8 = scmp.lt.u32.totalorder %s2302_s30, %s2356_s4 }
 0x3d5   : > { %p1853_p12 = scmp.lt.u32.totalorder %s1851_s11, %s1847_s0  ;;  %p1855_p2 = scmp.lt.u32.totalorder %s1847_s0, %s2302_s30 }
 0x3d6   : > { %p1849_p6 = pnand %p1848_p3, %p2400_p13 }
 0x3d7   : > { %p1854_p1 = por %p1853_p12, %p1852_p8 }
 0x3d8   : > { %p1850_p9 = pneg %p1849_p6 }
 0x3d9   : > { %p1856_p11 = por %p1855_p2, %p1854_p1 }
 0x3db   : > { %p1857_p0 = pnand %p1856_p11, %p1850_p9 }
 0x3dd   : > { %1860 = shalt.err (!%p1857_p0)
}
 0x3de   : > { %1622 = dma.vmem_to_hbm [thread:$0]  (%p2400_p13), %s2304_s10, 128, %s2302_s30, %s1324_s26  }
 0x3df PF: > { %s1350_s7 = sand.u32 1, %s1903_s15   ;;  %p2401_p5 = scmp.ne.s32.totalorder %s2386_s8, 0 }
 0x3e0   : > { %p2402_p10 = scmp.ge.s32.totalorder %s1923_s20, 2  ;;  %s1351_s28 = scalar_lea.sflag [#allocation5], %s1350_s7 }
 0x3e2   : > { %p1639_p7 = pnand %p2402_p10, %p2401_p5 }
 0x3e4   : > { %1898 = dma.done.wait (!%p1639_p7), %s1351_s28, 128  }
 0x3e5   : > { %1900 = vsyncadd (!%p1639_p7), %s1351_s28, 4294967168  ;;  %s24_s20 = sadd.s32 1, %s1923_s20   ;;  %s2403_s9 = sld [smem:[#allocation16_spill]] }
 0x3e6   : > { %p21_p4 = scmp.ge.s32.totalorder %s24_s20, 4   ;;  %s2404_s17 = sld [smem:[#allocation19_spill]] }
 0x3e7   : > { %s2405_s18 = sld [smem:[#allocation17_spill]]  ;;  %s2406_s19 = sld [smem:[#allocation18_spill]] }
 0x3e8   : > { %s2407_s15 = smov %s1907_s16  ;;  %23 = sbr.rel (!%p21_p4) target bundleno = 12 (0xc), region = 118 }
 0x3eb   : > { %s2408_s16 = smov %s2403_s9 }
 0x3ef   :  { %1356 = vsyncpa [#allocation4], 1 }
 0x3f0   :  { %1358 = vsyncpa [#allocation4 + $0x1], 1 }
 0x3f1   :  { %1359 = vsyncpa [#allocation7], 1 }
 0x3f2   :  { %1361 = vsyncpa [#allocation7 + $0x1], 1 }
 0x3f3   :  { %1362 = vsyncpa [#allocation10], 1 }
 0x3f4   :  { %1363 = vsyncpa [#allocation5], 1 }
 0x3f5   :  { %1365 = vsyncpa [#allocation5 + $0x1], 1 }

</bundles_post_ra>
